<compile_context>
chip_gen: v5e
topology: v5e:2x2
jax: 0.10.0
libtpu: 0.0.40
codegen_flags: <defaults>
</compile_context>

<pallas_src>
import functools

import jax
import jax.numpy as jnp
from jax.experimental import pallas as pl
from jax.experimental.pallas import tpu as pltpu


def _gbn_kernel(x_ref, w_ref, b_ref, seg_ref, o_ref, *, eps: float,
                inv_l: float, inv_lm1: float):
    # x_ref / o_ref : (RowsB, Lcols)       -- Gb groups, Rg rows each
    # w_ref / b_ref : (Gsteps, RowsB, 1)   -- fully resident per-row params
    # seg_ref       : (RowsB, RowsB)       -- block-diagonal 0/1 segment matrix
    j = pl.program_id(1)

    x = x_ref[...].astype(jnp.float32)
    seg = seg_ref[...]

    def group_reduce(row_vals):
        # (RowsB, 1) per-row partial sums -> (RowsB, 1) per-GROUP sums,
        # already broadcast back to every row of the group.  Lane width is
        # kept at 128 so the tiny matmul is MXU-shape friendly.
        wide = jnp.broadcast_to(row_vals, (row_vals.shape[0], 128))
        return jnp.dot(seg, wide, preferred_element_type=jnp.float32)[:, :1]

    # ---- pass 1: per-group mean (lane reduction on the dense block) --------
    row_s1 = jnp.sum(x, axis=1, keepdims=True)            # (RowsB, 1)
    mean = group_reduce(row_s1) * inv_l                    # (RowsB, 1)

    # ---- pass 2: unbiased variance about the mean (two-pass, stable) -------
    row_s2 = jnp.sum(jnp.square(x - mean), axis=1, keepdims=True)
    var = group_reduce(row_s2) * inv_lm1                   # (RowsB, 1)
    # Exact reciprocal on RowsB scalars only (approx could break 1e-5 tol).
    inv_std = 1.0 / (jnp.sqrt(var) + eps)                  # (RowsB, 1)

    # ---- fold normalization + affine into per-row scale/shift --------------
    #   out = (x - mean) * inv_std * w + b = x * scale + shift
    scale = w_ref[j] * inv_std                             # (RowsB, 1)
    shift = b_ref[j] - mean * scale                        # (RowsB, 1)
    o_ref[...] = (x * scale + shift).astype(o_ref.dtype)   # single store stream


def _vmem_capacity_bytes() -> int:
    try:
        cap = getattr(pltpu.get_tpu_info(), "vmem_capacity_bytes", None)
        if cap:
            return int(cap)
    except Exception:
        pass
    return 64 << 20  # conservative default (v7x per-TensorCore VMEM)


def group_batchnorm2d(x, weight, bias, group_num: int, eps: float = 1e-10):
    """x: (N, C, H, W); weight/bias: (C, 1, 1). Matches GroupBatchnorm2d.forward."""
    N, C, H, W = x.shape
    G = group_num
    assert C >= G and C % G == 0, "C must be a multiple of group_num"
    Cg = C // G
    HW = H * W
    L = Cg * HW                           # elements per (n, g) group
    itemsize = jnp.dtype(x.dtype).itemsize

    # ---- how many groups to fuse into one grid step (Gb divides G) ----------
    group_bytes = L * itemsize
    target_bytes = 2 << 20                # ~2 MiB of activation per step
    max_rows_fused = 512                  # keeps the segment matrix <= 1 MiB
    divs = [d for d in range(1, G + 1) if G % d == 0]
    fitting = [d for d in divs
               if d * group_bytes <= target_bytes and d * Cg <= max_rows_fused]
    Gb = max(fitting) if fitting else 1
    # Keep >= 2 grid steps when possible so both v7x TensorCores get work.
    if N * (G // Gb) < 2 and Gb > 1:
        Gb = max(d for d in divs if d < Gb)
    Gsteps = G // Gb

    # ---- lane width (last dim): multiple of 128, and must divide HW ---------
    Lcols = HW
    rows_per_chan = 1
    if HW % 128 == 0:
        # Split each channel across more rows only if that improves sublane
        # occupancy (lanes stay a multiple of 128).
        while Gb * Cg * rows_per_chan < 8 and Lcols % 256 == 0:
            Lcols //= 2
            rows_per_chan *= 2
    # TODO(synk): HW % 128 != 0 (e.g. H=W=14/28) falls back to Lcols=HW, which
    # is correct but uses masked (slower) loads/stores; a padded layout would
    # recover full store efficiency.

    Rg = Cg * rows_per_chan               # rows per group
    RowsB = Gb * Rg                       # sublane rows per grid step

    # ---- host-side, metadata-only reshapes -----------------------------------
    xg = x.reshape(N, Gsteps, RowsB, Lcols)
    # Per-row affine params (C * rows_per_chan elements total -- tiny), kept
    # fully resident in VMEM via a constant index_map (DMA'd once, not per step).
    w_rows = jnp.repeat(weight.reshape(C).astype(jnp.float32), rows_per_chan)
    b_rows = jnp.repeat(bias.reshape(C).astype(jnp.float32), rows_per_chan)
    w_rows = w_rows.reshape(Gsteps, RowsB, 1)
    b_rows = b_rows.reshape(Gsteps, RowsB, 1)
    # Block-diagonal 0/1 matrix: seg[i, k] = 1 iff rows i and k share a group.
    rid = jnp.arange(RowsB) // Rg
    seg = (rid[:, None] == rid[None, :]).astype(jnp.float32)

    # ---- capacity-aware VMEM budgeting (v5e/v6e 128 MiB, v7x 64 MiB) ---------
    block_bytes = RowsB * Lcols * itemsize
    small_bytes = 2 * Gsteps * RowsB * 4 + RowsB * RowsB * 4
    budget = max(_vmem_capacity_bytes() - (8 << 20), 16 << 20)
    # in x2 + out x2 (double-buffered) + ~2 block-sized temps for two-pass stats.
    est = 6 * block_bytes + small_bytes + (4 << 20)
    pipeline_kwargs = {}
    if est > budget:
        # A single group barely fits: accept exposed DMA with single buffering.
        # TODO(synk): for groups that do not fit VMEM at all, a two-pass
        # HW-tiled variant (stats pass + normalize pass) would be needed.
        pipeline_kwargs = {"pipeline_mode": pl.Buffered(1)}
        est = 4 * block_bytes + small_bytes + (4 << 20)
    vmem_limit = int(min(max(est, 32 << 20), budget))

    kernel = functools.partial(
        _gbn_kernel, eps=eps, inv_l=1.0 / L, inv_lm1=1.0 / max(L - 1, 1))

    numel = N * C * HW
    cost = pl.CostEstimate(
        flops=7 * numel,                       # two reduction passes + fused FMA
        transcendentals=N * G,                 # one sqrt per group
        bytes_accessed=2 * numel * itemsize,   # memory-bound: read x, write out
    )

    out = pl.pallas_call(
        kernel,
        out_shape=jax.ShapeDtypeStruct((N, Gsteps, RowsB, Lcols), x.dtype),
        grid=(N, Gsteps),
        in_specs=[
            pl.BlockSpec((None, None, RowsB, Lcols),
                         lambda n, j: (n, j, 0, 0), **pipeline_kwargs),
            pl.BlockSpec((Gsteps, RowsB, 1), lambda n, j: (0, 0, 0)),
            pl.BlockSpec((Gsteps, RowsB, 1), lambda n, j: (0, 0, 0)),
            pl.BlockSpec((RowsB, RowsB), lambda n, j: (0, 0)),
        ],
        out_specs=pl.BlockSpec((None, None, RowsB, Lcols),
                               lambda n, j: (n, j, 0, 0), **pipeline_kwargs),
        compiler_params=pltpu.CompilerParams(
            dimension_semantics=("parallel", "parallel"),
            vmem_limit_bytes=vmem_limit,
        ),
        cost_estimate=cost,
    )(xg, w_rows, b_rows, seg)

    return out.reshape(N, C, H, W)


def _reference(x, weight, bias, group_num, eps=1e-10):
    N, C, H, W = x.shape
    xg = x.reshape(N, group_num, -1)
    mean = jnp.mean(xg, axis=2, keepdims=True)
    std = jnp.std(xg, axis=2, keepdims=True, ddof=1)   # torch.std: unbiased
    xg = (xg - mean) / (std + eps)
    xr = xg.reshape(N, C, H, W)
    return xr * weight[None] + bias[None]


if __name__ == "__main__":
    # Module config (small, consistent with assert c_num >= group_num).
    N, C, H, W = 2, 8, 16, 16
    GROUP_NUM = 4
    EPS = 1e-10

    key = jax.random.PRNGKey(0)
    kx, kw = jax.random.split(key)
    x = jax.random.normal(kx, (N, C, H, W), dtype=jnp.float32)
    # Deterministic params: weight ~ randn(C,1,1), bias = zeros(C,1,1).
    weight = jax.random.normal(kw, (C, 1, 1), dtype=jnp.float32)
    bias = jnp.zeros((C, 1, 1), dtype=jnp.float32)

    out = group_batchnorm2d(x, weight, bias, GROUP_NUM, EPS)
    out = jax.block_until_ready(out)

    ref = _reference(x, weight, bias, GROUP_NUM, EPS)
    assert out.shape == (N, C, H, W)
    assert jnp.allclose(out, ref, atol=1e-5, rtol=1e-5)

    print("KERNEL_OK")
</pallas_src>

<mosaic_0001>
module attributes {stable_mosaic.version = 11 : i64} {
  func.func @_gbn_kernel(%arg0: i32, %arg1: i32, %arg2: memref<1x1x8x256xf32, #tpu.memory_space<vmem>>, %arg3: memref<1x8x1xf32, #tpu.memory_space<vmem>>, %arg4: memref<1x8x1xf32, #tpu.memory_space<vmem>>, %arg5: memref<8x8xf32, #tpu.memory_space<vmem>>, %arg6: memref<1x1x8x256xf32, #tpu.memory_space<vmem>>) attributes {dimension_semantics = [#tpu.dimension_semantics<parallel>, #tpu.dimension_semantics<parallel>], iteration_bounds = array<i64: 2, 1>, scalar_prefetch = 0 : i64, scratch_operands = 0 : i64, tpu.core_type = #tpu.core_type<tc>, window_params = [{transform_indices = @transform_0, window_bounds = array<i64: 1, 1, 8, 256>}, {pipeline_mode = #tpu.pipeline_mode<synchronous>, transform_indices = @transform_1, window_bounds = array<i64: 1, 8, 1>}, {pipeline_mode = #tpu.pipeline_mode<synchronous>, transform_indices = @transform_2, window_bounds = array<i64: 1, 8, 1>}, {pipeline_mode = #tpu.pipeline_mode<synchronous>, transform_indices = @transform_3, window_bounds = array<i64: 8, 8>}, {transform_indices = @transform_4, window_bounds = array<i64: 1, 1, 8, 256>}]} {
    %c0 = arith.constant 0 : index
    %c0_0 = arith.constant 0 : index
    %c0_1 = arith.constant 0 : index
    %c0_2 = arith.constant 0 : index
    %0 = vector.load %arg2[%c0, %c0_0, %c0_1, %c0_2] : memref<1x1x8x256xf32, #tpu.memory_space<vmem>>, vector<1x1x8x256xf32>
    %1 = vector.shape_cast %0 : vector<1x1x8x256xf32> to vector<8x256xf32>
    %c0_3 = arith.constant 0 : index
    %c0_4 = arith.constant 0 : index
    %2 = vector.load %arg5[%c0_3, %c0_4] : memref<8x8xf32, #tpu.memory_space<vmem>>, vector<8x8xf32>
    %cst = arith.constant dense<0.000000e+00> : vector<8xf32>
    %3 = vector.multi_reduction <add>, %1, %cst [1] : vector<8x256xf32> to vector<8xf32>
    %4 = vector.shape_cast %3 : vector<8xf32> to vector<8x1xf32>
    %5 = vector.shape_cast %4 : vector<8x1xf32> to vector<8x1xf32>
    %6 = vector.broadcast %5 : vector<8x1xf32> to vector<8x128xf32>
    %cst_5 = arith.constant dense<0.000000e+00> : vector<8x128xf32>
    %7 = tpu.matmul %2, %6, %cst_5 {dimension_numbers = #tpu.dot_dimension_numbers<[1], [0], [0], [1], [0, 0, 1, 1], [], []>} : vector<8x8xf32>, vector<8x128xf32>, vector<8x128xf32> -> vector<8x128xf32>
    %8 = vector.extract_strided_slice %7 {offsets = [0, 0], sizes = [8, 1], strides = [1, 1]} : vector<8x128xf32> to vector<8x1xf32>
    %cst_6 = arith.constant 0.001953125 : f32
    %9 = vector.broadcast %cst_6 : f32 to vector<8x1xf32>
    %10 = arith.mulf %8, %9 : vector<8x1xf32>
    %11 = vector.broadcast %10 : vector<8x1xf32> to vector<8x256xf32>
    %12 = arith.subf %1, %11 : vector<8x256xf32>
    %13 = arith.mulf %12, %12 : vector<8x256xf32>
    %cst_7 = arith.constant dense<0.000000e+00> : vector<8xf32>
    %14 = vector.multi_reduction <add>, %13, %cst_7 [1] : vector<8x256xf32> to vector<8xf32>
    %15 = vector.shape_cast %14 : vector<8xf32> to vector<8x1xf32>
    %16 = vector.shape_cast %15 : vector<8x1xf32> to vector<8x1xf32>
    %17 = vector.broadcast %16 : vector<8x1xf32> to vector<8x128xf32>
    %cst_8 = arith.constant dense<0.000000e+00> : vector<8x128xf32>
    %18 = tpu.matmul %2, %17, %cst_8 {dimension_numbers = #tpu.dot_dimension_numbers<[1], [0], [0], [1], [0, 0, 1, 1], [], []>} : vector<8x8xf32>, vector<8x128xf32>, vector<8x128xf32> -> vector<8x128xf32>
    %19 = vector.extract_strided_slice %18 {offsets = [0, 0], sizes = [8, 1], strides = [1, 1]} : vector<8x128xf32> to vector<8x1xf32>
    %cst_9 = arith.constant 0.00195694715 : f32
    %20 = vector.broadcast %cst_9 : f32 to vector<8x1xf32>
    %21 = arith.mulf %19, %20 : vector<8x1xf32>
    %22 = math.sqrt %21 : vector<8x1xf32>
    %cst_10 = arith.constant 1.000000e-10 : f32
    %23 = vector.broadcast %cst_10 : f32 to vector<8x1xf32>
    %24 = arith.addf %22, %23 : vector<8x1xf32>
    %cst_11 = arith.constant 1.000000e+00 : f32
    %25 = vector.broadcast %cst_11 : f32 to vector<8x1xf32>
    %26 = arith.divf %25, %24 : vector<8x1xf32>
    %27 = arith.index_cast %arg1 : i32 to index
    %c0_12 = arith.constant 0 : index
    %c0_13 = arith.constant 0 : index
    %28 = vector.load %arg3[%27, %c0_12, %c0_13] : memref<1x8x1xf32, #tpu.memory_space<vmem>>, vector<1x8x1xf32>
    %29 = vector.shape_cast %28 : vector<1x8x1xf32> to vector<8x1xf32>
    %30 = arith.mulf %29, %26 : vector<8x1xf32>
    %31 = arith.index_cast %arg1 : i32 to index
    %c0_14 = arith.constant 0 : index
    %c0_15 = arith.constant 0 : index
    %32 = vector.load %arg4[%31, %c0_14, %c0_15] : memref<1x8x1xf32, #tpu.memory_space<vmem>>, vector<1x8x1xf32>
    %33 = vector.shape_cast %32 : vector<1x8x1xf32> to vector<8x1xf32>
    %34 = arith.mulf %10, %30 : vector<8x1xf32>
    %35 = arith.subf %33, %34 : vector<8x1xf32>
    %36 = vector.broadcast %30 : vector<8x1xf32> to vector<8x256xf32>
    %37 = arith.mulf %1, %36 : vector<8x256xf32>
    %38 = vector.broadcast %35 : vector<8x1xf32> to vector<8x256xf32>
    %39 = arith.addf %37, %38 : vector<8x256xf32>
    %c0_16 = arith.constant 0 : index
    %c0_17 = arith.constant 0 : index
    %c0_18 = arith.constant 0 : index
    %c0_19 = arith.constant 0 : index
    %40 = vector.load %arg6[%c0_16, %c0_17, %c0_18, %c0_19] : memref<1x1x8x256xf32, #tpu.memory_space<vmem>>, vector<1x1x8x256xf32>
    %41 = vector.shape_cast %40 : vector<1x1x8x256xf32> to vector<8x256xf32>
    %42 = vector.shape_cast %39 : vector<8x256xf32> to vector<1x1x8x256xf32>
    tpu.vector_store %arg6[%c0_16, %c0_17, %c0_18, %c0_19], %42 {strides = array<i32>} : memref<1x1x8x256xf32, #tpu.memory_space<vmem>>, vector<1x1x8x256xf32>,
    return
  }
  func.func @transform_0(%arg0: i32, %arg1: i32) -> (i32, i32, i32, i32) {
    %c0_i32 = arith.constant 0 : i32
    %c0_i32_0 = arith.constant 0 : i32
    %c0_i32_1 = arith.constant 0 : i32
    return %arg0, %arg1, %c0_i32, %c0_i32_0 : i32, i32, i32, i32
  }
  func.func @transform_1(%arg0: i32, %arg1: i32) -> (i32, i32, i32) {
    %c0_i32 = arith.constant 0 : i32
    %c0_i32_0 = arith.constant 0 : i32
    %c0_i32_1 = arith.constant 0 : i32
    %c0_i32_2 = arith.constant 0 : i32
    return %c0_i32, %c0_i32_0, %c0_i32_1 : i32, i32, i32
  }
  func.func @transform_2(%arg0: i32, %arg1: i32) -> (i32, i32, i32) {
    %c0_i32 = arith.constant 0 : i32
    %c0_i32_0 = arith.constant 0 : i32
    %c0_i32_1 = arith.constant 0 : i32
    %c0_i32_2 = arith.constant 0 : i32
    return %c0_i32, %c0_i32_0, %c0_i32_1 : i32, i32, i32
  }
  func.func @transform_3(%arg0: i32, %arg1: i32) -> (i32, i32) {
    %c0_i32 = arith.constant 0 : i32
    %c0_i32_0 = arith.constant 0 : i32
    %c0_i32_1 = arith.constant 0 : i32
    return %c0_i32, %c0_i32_0 : i32, i32
  }
  func.func @transform_4(%arg0: i32, %arg1: i32) -> (i32, i32, i32, i32) {
    %c0_i32 = arith.constant 0 : i32
    %c0_i32_0 = arith.constant 0 : i32
    %c0_i32_1 = arith.constant 0 : i32
    return %arg0, %arg1, %c0_i32, %c0_i32_0 : i32, i32, i32, i32
  }
}

</mosaic_0001>

<bundles_post_ra>
// kernel: tpu_custom_call.1
= control target key start
LH: loop header
LB: loop body
LE: loop exit
PB: predicated region body
PF: predicated region fallthrough
CT: control target
= control target key end

     0   :  { %9 = vsyncpa [#allocation3], 0  ;;  %s831_s0 = inlined_call_operand.hbm [shape: f32[2,1,8,256], index: 0, kind: input, shape index: {}]   ;;  %s832_s1 = inlined_call_operand.vmem [shape: f32[1,8,1], index: 1, kind: input, shape index: {}]   ;;  %s833_s2 = inlined_call_operand.vmem [shape: f32[1,8,1], index: 2, kind: input, shape index: {}]   ;;  %s834_s3 = inlined_call_operand.vmem [shape: f32[8,8], index: 3, kind: input, shape index: {}]   ;;  %s835_s4 = inlined_call_operand.hbm [shape: f32[2,1,8,256], index: 4, kind: output, shape index: {}]  }
   0x1   :  { %11 = vsyncpa [#allocation3 + $0x1], 0 }
   0x2   :  { %12 = vsyncpa [#allocation4], 0 }
   0x3   :  { %14 = vsyncpa [#allocation4 + $0x1], 0  ;;  %s686_s15 = smov 0   ;;  %s688_s16 = smov 0  }
   0x4   :  { %s690_s17 = smov 0   ;;  %s692_s18 = smov 0  }
   0x5   :  { %s694_s19 = smov 0   ;;  %s696_s20 = smov 0  }
   0x6 LB: > { %s457_s21 = sadd.s32 4294967295, %s658_s20   ;;  %s458_s22 = sadd.s32 4294967294, %s658_s20   ;;  %s658_s20 = sphi %s696_s20, %s20_s20   ;;  %s654_s19 = sphi %s694_s19, %s844_s19   ;;  %s650_s18 = sphi %s692_s18, %s843_s18   ;;  %s646_s17 = sphi %s690_s17, %s842_s17   ;;  %s642_s16 = sphi %s688_s16, %s841_s16   ;;  %s638_s15 = sphi %s686_s15, %s840_s15  }
   0x7   : > { %s32_s23 = sadd.s32 1, %s654_s19  ;;  %s41_s24 = sadd.s32 1, %s646_s17 }
   0x8   : > { %p34_p0 = scmp.ge.s32.totalorder %s32_s23, 2  ;;  %p48_p1 = scmp.ne.s32.totalorder %s646_s17, %s642_s16 }
   0x9   : > { %p49_p2 = scmp.eq.s32.totalorder %s658_s20, 0  ;;  %p54_p3 = scmp.ne.s32.totalorder %s642_s16, %s638_s15 }
   0xa   : > { %s846_s23 = smov (%p34_p0, %s32_s23), 0  ;;  %p55_p5 = scmp.eq.s32.totalorder %s457_s21, 0 }
   0xb   : > { %p727_p4 = por %p49_p2, %p48_p1  ;;  %s36_s26 = ssub.s32 %s654_s19, %s846_s23 }
   0xc   : > { %p143_p6 = scmp.eq.s32.totalorder %s457_s21, 1  ;;  %p39_p7 = scmp.eq.s32.totalorder %s36_s26, 0 }
   0xd   : > { %p733_p8 = por %p55_p5, %p54_p3  ;;  %p149_p10 = scmp.eq.s32.totalorder %s458_s22, 1 }
   0xe   : > { %p737_p9 = por %p143_p6, %p48_p1  ;;  %p460_p12 = scmp.ge.s32.totalorder %s658_s20, 2 }
   0xf   : > { %s742_s29 = scalar_select %p39_p7, %s646_s17, %s41_s24  }
  0x10   : > { %p744_p11 = por %p149_p10, %p54_p3  ;;  %p488_p13 = scmp.lt.s32.totalorder %s658_s20, 2 }
  0x11   : > { %s178_s5 = sand.u32 1, %s646_s17   ;;  %s474_s7 = sshll.u32 %s654_s19, 4 }
  0x12   : > { %s461_s6 = sshll.u32 %s178_s5, 4  ;;  %s189_s10 = scalar_lea.hbm %s831_s0, %s474_s7 }
  0x13   : > { %s182_s11 = scalar_lea.vmem [#allocation2], %s461_s6  ;;  %s191_s13 = sshll.u32 %s189_s10, 4  ;;  %s192_s13 = int_to_ptr.hbm [resolvable:$true] %s191_s13 }
  0x14   : > { %s193_s12 = sshll.u32 %s182_s11, 4  ;;  %p481_p0 = pnand %p488_p13, %p727_p4  ;;  %s194_s12 = int_to_ptr.vmem [resolvable:$true] %s193_s12 }
  0x15   : > { %p464_p1 = scmp.ge.s32.totalorder %s658_s20, 1  ;;  %p198_p2 = scmp.lt.s32.totalorder %s658_s20, 3 }
  0x16   : > { %s179_s14 = scalar_lea.sflag [#allocation3], %s178_s5 }
  0x17   : > { %483 = dma.hbm_to_vmem [thread:$0]  (!%p481_p0), %s192_s13, 256, %s194_s12, %s179_s14  }
  0x18   : > { %p199_p3 = pnand %p464_p1, %p198_p2 }
  0x19   : > { %s760_s21 = sand.u32 (!%p199_p3), 1, %s642_s16  }
  0x1a   : > { %202 = sbr.rel (%p199_p3) target bundleno = 811 (0x32b), region = 36  ;;  %s465_s22 = sshll.u32 (!%p199_p3), %s760_s21, 4 }
  0x1b   : > { %s205_s24 = scalar_lea.sflag (!%p199_p3), [#allocation3], %s760_s21  ;;  %s208_s26 = scalar_lea.vmem (!%p199_p3), [#allocation2], %s465_s22 }
  0x1f   : > { %629 = dma.done.wait (%p733_p8), %s205_s24, 256  }
  0x20   : > { %631 = vsyncadd (%p733_p8), %s205_s24, 4294967040  ;;  %v770_v0 = vld [vmem:[%s208_s26] sm:$0xff]  ;;  %v772_v1 = vld [vmem:[%s208_s26 + $0x8] sm:$0xff]  ;;  %vm240_vm0 = vcmask 64512   ;;  %v660_v5 = vmov 0   ;;  %s475_s9 = sshll.u32 %s650_s18, 4 }
  0x21   : > { %v237_v2 = vadd.f32 %v772_v1, %v770_v0  ;;  %v236_v3 = vld [vmem:[%s834_s3] sm:$0xff]  ;;  %539 = vset.pattern.permute.xlu0 %v660_v5  ;;  %540 = vset.pattern.permute.xlu1 %v660_v5  ;;  %s364_s12 = scalar_lea.hbm %s835_s4, %s475_s9  ;;  %s233_s13 = scalar_lea.vmem [#allocation5], %s465_s22 }
  0x22   : > { %541 = vset.pattern.permute.xlu2 %v660_v5  ;;  %v328_v36 = vld [vmem:[%s832_s1] sm:$0xff]  ;;  %s366_s14 = sshll.u32 %s233_s13, 4  ;;  %s368_s24 = sshll.u32 %s364_s12, 4  ;;  %s367_s14 = int_to_ptr.vmem [resolvable:$true] %s366_s14  ;;  %s369_s24 = int_to_ptr.hbm [resolvable:$true] %s368_s24 }
  0x23   : > { %238 = vadd.xlane.f32.xlu0 %v237_v2  ;;  %v331_v40 = vld [vmem:[%s833_s2] sm:$0xff]  ;;  %s351_s18 = scalar_lea.sflag [#allocation4], %s760_s21  ;;  %s590_s26 = sshra.s32 %s369_s24, 4  ;;  %s591_s26 = int_to_ptr.hbm [resolvable:$true] %s590_s26 }
  0x24   : > { %s592_s25 = scalar_lea.hbm %s591_s26, 16  ;;  %s596_s22 = scalar_lea.hbm %s835_s4, 32 }
  0x25   : > { %p593_p4 = scmp.ne.s32.totalorder %s591_s26, %s592_s25  ;;  %p597_p7 = scmp.lt.s32.totalorder %s591_s26, %s835_s4 }
  0x26   : > { %p598_p8 = scmp.lt.s32.totalorder %s596_s22, %s592_s25 }
  0x27   : > { %p594_p5 = pnand %p593_p4, %p737_p9 }
  0x28   : > { %p599_p10 = por %p598_p8, %p597_p7 }
  0x29   : > { %p595_p6 = pneg %p594_p5 }
  0x2b   : > { %p600_p13 = pnand %p599_p10, %p595_p6 }
  0x96   : > { %v239_v4 = vpop.xlane.xlu0 %238 }
  0x97   : > { %259 = vmatpush.msra.mxu0 %v239_v4 }
  0x98   : > { %467 = vmatmul.msk.f32.vlgmr.msra.gmra.mxu0 %vm240_vm0, %v236_v3 }
 0x115   : > { %v261_v6 = vpop.f32.mrf.mxu0 }
 0x116   : > { %v264_v7 = vmul.f32 0.001953125, %v261_v6 }
 0x118   : > { %267 = vperm.xlu0 %539, %v264_v7  }
 0x18a   : > { %v268_v8 = vpop.permute.xlu0 %267 }
 0x18b   : > { %v270_v9 = vsub.f32 %v770_v0, %v268_v8  ;;  %v271_v10 = vsub.f32 %v772_v1, %v268_v8 }
 0x18d   : > { %v272_v11 = vmul.f32 %v270_v9, %v270_v9  ;;  %v273_v12 = vmul.f32 %v271_v10, %v271_v10 }
 0x18f   : > { %v274_v13 = vadd.f32 %v273_v12, %v272_v11 }
 0x191   : > { %275 = vadd.xlane.f32.xlu1 %v274_v13 }
 0x204   : > { %v276_v14 = vpop.xlane.xlu1 %275 }
 0x205   : > { %292 = vmatpush.msra.mxu1 %v276_v14 }
 0x206   : > { %468 = vmatmul.msk.f32.vlgmr.msra.gmra.mxu1 %vm240_vm0, %v236_v3 }
 0x283   : > { %v294_v15 = vpop.f32.mrf.mxu1 }
 0x284   : > { %v297_v16 = vmul.f32 0.0019569471, %v294_v15 }
 0x286   : > { %542 = vrsqrt.f32 %v297_v16  ;;  %vm305_vm1 = vcmp.eq.f32.partialorder %v297_v16, inf  ;;  %v308_v24 = vand.u32 2147483648, %v297_v16  ;;  %vm307_vm2 = vcmp.eq.f32.partialorder %v297_v16, 0.0 }
 0x28c   : > { %v543_v17 = vpop.eup %542 }
 0x28d   : > { %v299_v18 = vmul.f32 %v543_v17, %v297_v16 }
 0x28f   : > { %v300_v19 = vmul.f32 %v543_v17, %v299_v18 }
 0x291   : > { %v301_v20 = vmul.f32 0.5, %v300_v19 }
 0x293   : > { %v302_v21 = vsub.f32 1.5, %v301_v20 }
 0x295   : > { %v303_v22 = vmul.f32 %v543_v17, %v302_v21 }
 0x297   : > { %v304_v23 = vmul.f32 %v303_v22, %v297_v16 }
 0x299   : > { %v306_v25 = vsel %vm305_vm1, %v297_v16, %v304_v23 }
 0x29a   : > { %v309_v26 = vsel %vm307_vm2, %v308_v24, %v306_v25 }
 0x29b   : > { %v310_v27 = vadd.f32 1e-10, %v309_v26 }
 0x29d   : > { %544 = vrcp.f32 %v310_v27  ;;  %v322_v31 = vand.u32 2147483648, %v310_v27  ;;  %v320_v33 = vand.u32 2147483647, %v310_v27  ;;  %vm316_vm4 = vweird.f32 %v310_v27 }
 0x29f   : > { %v323_v35 = vor.u32 1.1754944e-38, %v322_v31  ;;  %vm321_vm6 = vcmp.eq.f32.partialorder %v320_v33, 8.507059e+37 }
 0x2a3   : > { %v545_v28 = vpop.eup %544 }
 0x2a4   : > { %v312_v29 = vmul.f32 %v545_v28, %v310_v27  ;;  %vm317_vm3 = vweird.f32 %v545_v28 }
 0x2a5   : > { %vm318_vm5 = vmor %vm316_vm4, %vm317_vm3 }
 0x2a6   : > { %v313_v30 = vsub.f32 1.0, %v312_v29 }
 0x2a8   : > { %v314_v32 = vmul.f32 %v545_v28, %v313_v30 }
 0x2aa   : > { %v315_v34 = vadd.f32 %v545_v28, %v314_v32 }
 0x2ac   : > { %v319_v37 = vsel %vm318_vm5, %v545_v28, %v315_v34 }
 0x2ad   : > { %v324_v38 = vsel %vm321_vm6, %v323_v35, %v319_v37 }
 0x2ae   : > { %v329_v39 = vmul.f32 %v328_v36, %v324_v38 }
 0x2b0   : > { %336 = vperm.xlu1 %540, %v329_v39   ;;  %v332_v41 = vmul.f32 %v329_v39, %v264_v7 }
 0x2b2   : > { %v333_v42 = vsub.f32 %v331_v40, %v332_v41 }
 0x2b4   : > { %343 = vperm.xlu2 %541, %v333_v42  }
 0x30e   : > { %v344_v46 = vpop.permute.xlu2 %343 }
 0x322   : > { %v337_v43 = vpop.permute.xlu1 %336 }
 0x323   : > { %v339_v44 = vmul.f32 %v337_v43, %v770_v0  ;;  %v340_v45 = vmul.f32 %v337_v43, %v772_v1 }
 0x325   : > { %v346_v47 = vadd.f32 %v344_v46, %v339_v44  ;;  %v347_v48 = vadd.f32 %v344_v46, %v340_v45 }
 0x327   : > { %348 = vst [vmem:[%s233_s13] sm:$0xff] %v346_v47 }
 0x328   : > { %349 = vst [vmem:[%s233_s13 + $0x8] sm:$0xff] %v347_v48 }
 0x329   : > { %603 = shalt.err (!%p600_p13)
}
 0x32a   : > { %478 = dma.vmem_to_hbm [thread:$0]  (%p737_p9), %s367_s14, 256, %s369_s24, %s351_s18  }
 0x32b PF: > { %s380_s21 = sand.u32 1, %s638_s15   ;;  %p485_p0 = pnand %p460_p12, %p744_p11 }
 0x32c   : > { %s381_s8 = scalar_lea.sflag [#allocation4], %s380_s21 }
 0x32d   : > { %p486_p1 = pneg %p485_p0 }
 0x32f   : > { %633 = dma.done.wait (%p486_p1), %s381_s8, 256  }
 0x330   : > { %635 = vsyncadd (%p486_p1), %s381_s8, 4294967040  ;;  %s20_s20 = sadd.s32 1, %s658_s20   ;;  %s840_s15 = smov %s642_s16 }
 0x331   : > { %p17_p2 = scmp.ge.s32.totalorder %s20_s20, 4   ;;  %s841_s16 = smov %s646_s17 }
 0x332   : > { %s842_s17 = smov %s742_s29  ;;  %s843_s18 = smov %s654_s19 }
 0x333   : > { %s844_s19 = smov %s846_s23  ;;  %19 = sbr.rel (!%p17_p2) target bundleno = 6 (0x6), region = 83 }
 0x338   :  { %387 = vsyncpa [#allocation3], 1 }
 0x339   :  { %389 = vsyncpa [#allocation3 + $0x1], 1 }
 0x33a   :  { %390 = vsyncpa [#allocation4], 1 }
 0x33b   :  { %392 = vsyncpa [#allocation4 + $0x1], 1 }

</bundles_post_ra>
